<compile_context>
chip_gen: v5e
topology: v5e:2x2
jax: 0.10.0
libtpu: 0.0.40
codegen_flags: <defaults>
</compile_context>

<pallas_src>
import functools
import math

import numpy as np
import jax
import jax.numpy as jnp
from jax.experimental import pallas as pl
from jax.experimental.pallas import tpu as pltpu


def _erf(x):
    # Abramowitz & Stegun 7.1.26 rational approximation (max abs err ~1.5e-7).
    # Keeps the *exact* GELU (PyTorch nn.GELU default) lowering to exp/arith only.
    a1, a2, a3, a4, a5 = 0.254829592, -0.284496736, 1.421413741, -1.453152027, 1.061405429
    p = 0.3275911
    sgn = jnp.where(x >= 0.0, 1.0, -1.0)
    ax = jnp.abs(x)
    t = 1.0 / (1.0 + p * ax)
    poly = ((((a5 * t + a4) * t + a3) * t + a2) * t + a1) * t
    return sgn * (1.0 - poly * jnp.exp(-ax * ax))


def _gelu_exact(x):
    return 0.5 * x * (1.0 + _erf(x * (1.0 / math.sqrt(2.0))))


def _layernorm(x, w, b, eps=1e-5):
    mu = jnp.mean(x, axis=-1, keepdims=True)
    var = jnp.mean((x - mu) ** 2, axis=-1, keepdims=True)
    return (x - mu) * jax.lax.rsqrt(var + eps) * w + b


def _block_kernel(x_ref, ln1w_ref, ln1b_ref, wqkv_ref, wproj_ref, bproj_ref,
                  ln2w_ref, ln2b_ref, wfc1_ref, bfc1_ref, wfc2_ref, bfc2_ref,
                  o_ref, attn_ref, *, num_heads, scale):
    bf16 = jnp.bfloat16
    x = x_ref[0].astype(jnp.float32)                       # (N, D) f32 residual
    n_tok, dim = x.shape
    hd = dim // num_heads

    # ---------------- attention branch: x + proj(MHSA(LN1(x))) ----------------
    xn = _layernorm(x, ln1w_ref[0], ln1b_ref[0])
    qkv = jnp.dot(xn.astype(bf16), wqkv_ref[...],
                  preferred_element_type=jnp.float32)      # (N, 3D) f32 acc
    qkv_b = qkv.astype(bf16)                               # bf16 MXU operands

    # Static head loop (small H here). Per-head output is written into a VMEM
    # scratch at its column offset; the output projection is then a single
    # full-contraction-depth (N, D) @ (D, D) matmul on the MXU.
    # TODO(synk): for large H use lax.fori_loop + aligned per-head layout, and
    # for large N add a token-tile grid axis with online (flash) softmax.
    for h in range(num_heads):
        q = qkv_b[:, h * hd:(h + 1) * hd]                  # (N, hd)
        k = qkv_b[:, dim + h * hd:dim + (h + 1) * hd]      # (N, hd)
        v = qkv_b[:, 2 * dim + h * hd:2 * dim + (h + 1) * hd]
        # scores = q @ k^T * scale (contract head dim; no explicit transpose)
        s = jax.lax.dot_general(q, k, (((1,), (1,)), ((), ())),
                                preferred_element_type=jnp.float32) * scale
        s = s - jnp.max(s, axis=-1, keepdims=True)
        p = jnp.exp(s)
        p = p * pl.reciprocal(jnp.sum(p, axis=-1, keepdims=True), approx=True)
        out_h = jnp.dot(p.astype(bf16), v,
                        preferred_element_type=jnp.float32)  # (N, hd)
        attn_ref[:, h * hd:(h + 1) * hd] = out_h.astype(attn_ref.dtype)

    proj = jnp.dot(attn_ref[...], wproj_ref[...],
                   preferred_element_type=jnp.float32)     # (N, D), one K=D matmul
    x = x + proj + bproj_ref[0]

    # ---------------- MLP branch: x + fc2(GELU(fc1(LN2(x)))) ----------------
    xn2 = _layernorm(x, ln2w_ref[0], ln2b_ref[0])
    h1 = jnp.dot(xn2.astype(bf16), wfc1_ref[...],
                 preferred_element_type=jnp.float32) + bfc1_ref[0]
    h1 = _gelu_exact(h1)                                   # f32 elementwise
    h2 = jnp.dot(h1.astype(bf16), wfc2_ref[...],
                 preferred_element_type=jnp.float32) + bfc2_ref[0]
    o_ref[0] = (x + h2).astype(o_ref.dtype)


def vit_block_forward(x, params, num_heads):
    B, N, D = x.shape
    hidden = params["w_fc1"].shape[1]
    scale = (D // num_heads) ** -0.5
    kernel = functools.partial(_block_kernel, num_heads=num_heads, scale=scale)

    # Weights / biases / LN params are reused by every grid step: keep one copy
    # resident in VMEM for the whole kernel (no per-step DMA, no double-buffer).
    vmem = pl.BlockSpec(memory_space=pltpu.MemorySpace.VMEM)

    in_specs = [
        pl.BlockSpec((1, N, D), lambda b: (b, 0, 0)),      # x: one batch elem / step
        vmem, vmem,                                        # LN1 gamma, beta (f32)
        vmem,                                              # qkv weight (bf16)
        vmem, vmem,                                        # proj weight (bf16), bias (f32)
        vmem, vmem,                                        # LN2 gamma, beta (f32)
        vmem, vmem,                                        # fc1 weight (bf16), bias (f32)
        vmem, vmem,                                        # fc2 weight (bf16), bias (f32)
    ]

    return pl.pallas_call(
        kernel,
        grid=(B,),
        in_specs=in_specs,
        out_specs=pl.BlockSpec((1, N, D), lambda b: (b, 0, 0)),
        out_shape=jax.ShapeDtypeStruct((B, N, D), x.dtype),
        scratch_shapes=[pltpu.VMEM((N, D), jnp.bfloat16)],   # concatenated head outputs
        compiler_params=pltpu.CompilerParams(
            # Each batch element is independent -> let Mosaic shard the grid
            # across TensorCores (v7x megacore); no-op on single-TC chips.
            dimension_semantics=("parallel",),
            # Raise the scoped VMEM budget above the 16/32 MiB default so the
            # resident weight set + activations fit at real ViT sizes
            # (still < v7x's 64 MiB physical VMEM).
            vmem_limit_bytes=48 * 1024 * 1024,
        ),
    )(x, params["ln1_w"], params["ln1_b"], params["w_qkv"],
      params["w_proj"], params["b_proj"], params["ln2_w"], params["ln2_b"],
      params["w_fc1"], params["b_fc1"], params["w_fc2"], params["b_fc2"])


def _reference(x, params, num_heads):
    """Pure-JAX reference mirroring the PyTorch Block forward with the same
    mixed precision as the kernel (bf16 MXU inputs, f32 accumulation/elementwise)."""
    B, N, D = x.shape
    hd = D // num_heads
    scale = hd ** -0.5
    bf16, f32 = jnp.bfloat16, jnp.float32

    def ln(v, w, b):
        mu = v.mean(-1, keepdims=True)
        var = ((v - mu) ** 2).mean(-1, keepdims=True)
        return (v - mu) / jnp.sqrt(var + 1e-5) * w + b

    def mm(a, w):
        return jnp.dot(a.astype(bf16), w.astype(bf16), preferred_element_type=f32)

    xn = ln(x, params["ln1_w"][0], params["ln1_b"][0])
    qkv = mm(xn, params["w_qkv"]).astype(bf16).astype(f32)
    qkv = qkv.reshape(B, N, 3, num_heads, hd).transpose(2, 0, 3, 1, 4)
    q, k, v = qkv[0], qkv[1], qkv[2]                       # (B, H, N, hd)
    s = jnp.einsum("bhnd,bhmd->bhnm", q.astype(bf16), k.astype(bf16),
                   preferred_element_type=f32) * scale
    p = jax.nn.softmax(s, axis=-1)
    out = jnp.einsum("bhnm,bhmd->bhnd", p.astype(bf16), v.astype(bf16),
                     preferred_element_type=f32)
    out = out.astype(bf16).astype(f32)                     # kernel scratch is bf16
    out = out.transpose(0, 2, 1, 3).reshape(B, N, D)
    x = x + mm(out, params["w_proj"]) + params["b_proj"][0]

    xn2 = ln(x, params["ln2_w"][0], params["ln2_b"][0])
    h1 = mm(xn2, params["w_fc1"]) + params["b_fc1"][0]
    h1 = jax.nn.gelu(h1, approximate=False)
    return x + mm(h1, params["w_fc2"]) + params["b_fc2"][0]


if __name__ == "__main__":
    B, N, D = 2, 8, 32
    num_heads = 4
    mlp_ratio = 4.0
    hidden = int(D * mlp_ratio)

    key = jax.random.PRNGKey(0)
    ks = jax.random.split(key, 8)
    f32, bf16 = jnp.float32, jnp.bfloat16

    params = {
        "ln1_w": jnp.ones((1, D), f32),
        "ln1_b": jnp.zeros((1, D), f32),
        "w_qkv": (0.02 * jax.random.normal(ks[0], (D, 3 * D), f32)).astype(bf16),
        "w_proj": (0.02 * jax.random.normal(ks[1], (D, D), f32)).astype(bf16),
        "b_proj": 0.01 * jax.random.normal(ks[2], (1, D), f32),
        "ln2_w": jnp.ones((1, D), f32),
        "ln2_b": jnp.zeros((1, D), f32),
        "w_fc1": (0.02 * jax.random.normal(ks[3], (D, hidden), f32)).astype(bf16),
        "b_fc1": 0.01 * jax.random.normal(ks[4], (1, hidden), f32),
        "w_fc2": (0.02 * jax.random.normal(ks[5], (hidden, D), f32)).astype(bf16),
        "b_fc2": 0.01 * jax.random.normal(ks[6], (1, D), f32),
    }
    x = jax.random.normal(ks[7], (B, N, D), f32)

    out = vit_block_forward(x, params, num_heads)
    out = jax.block_until_ready(out)

    ref = jax.block_until_ready(_reference(x, params, num_heads))
    # Tolerance covers the approximate EUP reciprocal in the softmax and the
    # rational-erf GELU; all bf16 roundings are mirrored in the reference.
    np.testing.assert_allclose(np.asarray(out), np.asarray(ref), rtol=1e-2, atol=2e-3)

    print("KERNEL_OK")
</pallas_src>

<mosaic_0001>
module attributes {stable_mosaic.version = 11 : i64} {
  func.func @_block_kernel(%arg0: i32, %arg1: memref<1x8x32xf32, #tpu.memory_space<vmem>>, %arg2: memref<1x32xf32, #tpu.memory_space<vmem>>, %arg3: memref<1x32xf32, #tpu.memory_space<vmem>>, %arg4: memref<32x96xbf16, #tpu.memory_space<vmem>>, %arg5: memref<32x32xbf16, #tpu.memory_space<vmem>>, %arg6: memref<1x32xf32, #tpu.memory_space<vmem>>, %arg7: memref<1x32xf32, #tpu.memory_space<vmem>>, %arg8: memref<1x32xf32, #tpu.memory_space<vmem>>, %arg9: memref<32x128xbf16, #tpu.memory_space<vmem>>, %arg10: memref<1x128xf32, #tpu.memory_space<vmem>>, %arg11: memref<128x32xbf16, #tpu.memory_space<vmem>>, %arg12: memref<1x32xf32, #tpu.memory_space<vmem>>, %arg13: memref<1x8x32xf32, #tpu.memory_space<vmem>>, %arg14: memref<8x32xbf16, #tpu.memory_space<vmem>>) attributes {dimension_semantics = [#tpu.dimension_semantics<parallel>], iteration_bounds = array<i64: 2>, scalar_prefetch = 0 : i64, scratch_operands = 1 : i64, tpu.core_type = #tpu.core_type<tc>, window_params = [{transform_indices = @transform_0, window_bounds = array<i64: 1, 8, 32>}, {pipeline_mode = #tpu.pipeline_mode<synchronous>, transform_indices = @transform_1, window_bounds = array<i64: 1, 32>}, {pipeline_mode = #tpu.pipeline_mode<synchronous>, transform_indices = @transform_2, window_bounds = array<i64: 1, 32>}, {pipeline_mode = #tpu.pipeline_mode<synchronous>, transform_indices = @transform_3, window_bounds = array<i64: 32, 96>}, {pipeline_mode = #tpu.pipeline_mode<synchronous>, transform_indices = @transform_4, window_bounds = array<i64: 32, 32>}, {pipeline_mode = #tpu.pipeline_mode<synchronous>, transform_indices = @transform_5, window_bounds = array<i64: 1, 32>}, {pipeline_mode = #tpu.pipeline_mode<synchronous>, transform_indices = @transform_6, window_bounds = array<i64: 1, 32>}, {pipeline_mode = #tpu.pipeline_mode<synchronous>, transform_indices = @transform_7, window_bounds = array<i64: 1, 32>}, {pipeline_mode = #tpu.pipeline_mode<synchronous>, transform_indices = @transform_8, window_bounds = array<i64: 32, 128>}, {pipeline_mode = #tpu.pipeline_mode<synchronous>, transform_indices = @transform_9, window_bounds = array<i64: 1, 128>}, {pipeline_mode = #tpu.pipeline_mode<synchronous>, transform_indices = @transform_10, window_bounds = array<i64: 128, 32>}, {pipeline_mode = #tpu.pipeline_mode<synchronous>, transform_indices = @transform_11, window_bounds = array<i64: 1, 32>}, {transform_indices = @transform_12, window_bounds = array<i64: 1, 8, 32>}]} {
    %c0 = arith.constant 0 : index
    %c0_0 = arith.constant 0 : index
    %c0_1 = arith.constant 0 : index
    %0 = vector.load %arg1[%c0, %c0_0, %c0_1] : memref<1x8x32xf32, #tpu.memory_space<vmem>>, vector<1x8x32xf32>
    %1 = vector.shape_cast %0 : vector<1x8x32xf32> to vector<8x32xf32>
    %c0_2 = arith.constant 0 : index
    %c0_3 = arith.constant 0 : index
    %2 = vector.load %arg2[%c0_2, %c0_3] : memref<1x32xf32, #tpu.memory_space<vmem>>, vector<1x32xf32>
    %3 = vector.shape_cast %2 : vector<1x32xf32> to vector<32xf32>
    %c0_4 = arith.constant 0 : index
    %c0_5 = arith.constant 0 : index
    %4 = vector.load %arg3[%c0_4, %c0_5] : memref<1x32xf32, #tpu.memory_space<vmem>>, vector<1x32xf32>
    %5 = vector.shape_cast %4 : vector<1x32xf32> to vector<32xf32>
    %cst = arith.constant dense<0.000000e+00> : vector<8xf32>
    %6 = vector.multi_reduction <add>, %1, %cst [1] : vector<8x32xf32> to vector<8xf32>
    %7 = vector.shape_cast %6 : vector<8xf32> to vector<8x1xf32>
    %cst_6 = arith.constant 3.200000e+01 : f32
    %8 = vector.broadcast %cst_6 : f32 to vector<8x1xf32>
    %9 = arith.divf %7, %8 : vector<8x1xf32>
    %10 = vector.broadcast %9 : vector<8x1xf32> to vector<8x32xf32>
    %11 = arith.subf %1, %10 : vector<8x32xf32>
    %12 = arith.mulf %11, %11 : vector<8x32xf32>
    %cst_7 = arith.constant dense<0.000000e+00> : vector<8xf32>
    %13 = vector.multi_reduction <add>, %12, %cst_7 [1] : vector<8x32xf32> to vector<8xf32>
    %14 = vector.shape_cast %13 : vector<8xf32> to vector<8x1xf32>
    %cst_8 = arith.constant 3.200000e+01 : f32
    %15 = vector.broadcast %cst_8 : f32 to vector<8x1xf32>
    %16 = arith.divf %14, %15 : vector<8x1xf32>
    %17 = vector.broadcast %9 : vector<8x1xf32> to vector<8x32xf32>
    %18 = arith.subf %1, %17 : vector<8x32xf32>
    %cst_9 = arith.constant 9.99999974E-6 : f32
    %19 = vector.broadcast %cst_9 : f32 to vector<8x1xf32>
    %20 = arith.addf %16, %19 : vector<8x1xf32>
    %21 = math.rsqrt %20 : vector<8x1xf32>
    %22 = vector.broadcast %21 : vector<8x1xf32> to vector<8x32xf32>
    %23 = arith.mulf %18, %22 : vector<8x32xf32>
    %24 = vector.shape_cast %3 : vector<32xf32> to vector<1x32xf32>
    %25 = vector.broadcast %24 : vector<1x32xf32> to vector<8x32xf32>
    %26 = arith.mulf %23, %25 : vector<8x32xf32>
    %27 = vector.shape_cast %5 : vector<32xf32> to vector<1x32xf32>
    %28 = vector.broadcast %27 : vector<1x32xf32> to vector<8x32xf32>
    %29 = arith.addf %26, %28 : vector<8x32xf32>
    %30 = arith.truncf %29 : vector<8x32xf32> to vector<8x32xbf16>
    %c0_10 = arith.constant 0 : index
    %c0_11 = arith.constant 0 : index
    %31 = vector.load %arg4[%c0_10, %c0_11] : memref<32x96xbf16, #tpu.memory_space<vmem>>, vector<32x96xbf16>
    %cst_12 = arith.constant dense<0.000000e+00> : vector<8x96xf32>
    %32 = tpu.matmul %30, %31, %cst_12 {dimension_numbers = #tpu.dot_dimension_numbers<[1], [0], [0], [1], [0, 0, 1, 1], [], []>} : vector<8x32xbf16>, vector<32x96xbf16>, vector<8x96xf32> -> vector<8x96xf32>
    %33 = arith.truncf %32 : vector<8x96xf32> to vector<8x96xbf16>
    %34 = vector.extract_strided_slice %33 {offsets = [0, 0], sizes = [8, 8], strides = [1, 1]} : vector<8x96xbf16> to vector<8x8xbf16>
    %35 = vector.extract_strided_slice %33 {offsets = [0, 32], sizes = [8, 8], strides = [1, 1]} : vector<8x96xbf16> to vector<8x8xbf16>
    %36 = vector.extract_strided_slice %33 {offsets = [0, 64], sizes = [8, 8], strides = [1, 1]} : vector<8x96xbf16> to vector<8x8xbf16>
    %cst_13 = arith.constant dense<0.000000e+00> : vector<8x8xf32>
    %37 = tpu.matmul %34, %35, %cst_13 {dimension_numbers = #tpu.dot_dimension_numbers<[1], [1], [0], [0], [0, 0, 1, 0], [], []>} : vector<8x8xbf16>, vector<8x8xbf16>, vector<8x8xf32> -> vector<8x8xf32>
    %cst_14 = arith.constant 0.353553385 : f32
    %38 = vector.broadcast %cst_14 : f32 to vector<8x8xf32>
    %39 = arith.mulf %37, %38 : vector<8x8xf32>
    %cst_15 = arith.constant dense<0xFF800000> : vector<8xf32>
    %40 = vector.multi_reduction <maximumf>, %39, %cst_15 [1] : vector<8x8xf32> to vector<8xf32>
    %41 = vector.shape_cast %40 : vector<8xf32> to vector<8x1xf32>
    %42 = vector.broadcast %41 : vector<8x1xf32> to vector<8x8xf32>
    %43 = arith.subf %39, %42 : vector<8x8xf32>
    %44 = math.exp %43 : vector<8x8xf32>
    %cst_16 = arith.constant dense<0.000000e+00> : vector<8xf32>
    %45 = vector.multi_reduction <add>, %44, %cst_16 [1] : vector<8x8xf32> to vector<8xf32>
    %46 = vector.shape_cast %45 : vector<8xf32> to vector<8x1xf32>
    %47 = tpu.reciprocal %46 {approx = true} : vector<8x1xf32> -> vector<8x1xf32>
    %48 = vector.broadcast %47 : vector<8x1xf32> to vector<8x8xf32>
    %49 = arith.mulf %44, %48 : vector<8x8xf32>
    %50 = arith.truncf %49 : vector<8x8xf32> to vector<8x8xbf16>
    %cst_17 = arith.constant dense<0.000000e+00> : vector<8x8xf32>
    %51 = tpu.matmul %50, %36, %cst_17 {dimension_numbers = #tpu.dot_dimension_numbers<[1], [0], [0], [1], [0, 0, 1, 1], [], []>} : vector<8x8xbf16>, vector<8x8xbf16>, vector<8x8xf32> -> vector<8x8xf32>
    %52 = arith.truncf %51 : vector<8x8xf32> to vector<8x8xbf16>
    %c0_18 = arith.constant 0 : index
    %c0_19 = arith.constant 0 : index
    %53 = vector.load %arg14[%c0_18, %c0_19] : memref<8x32xbf16, #tpu.memory_space<vmem>>, vector<8x8xbf16>
    tpu.vector_store %arg14[%c0_18, %c0_19], %52 {strides = array<i32>} : memref<8x32xbf16, #tpu.memory_space<vmem>>, vector<8x8xbf16>,
    %54 = vector.extract_strided_slice %33 {offsets = [0, 8], sizes = [8, 8], strides = [1, 1]} : vector<8x96xbf16> to vector<8x8xbf16>
    %55 = vector.extract_strided_slice %33 {offsets = [0, 40], sizes = [8, 8], strides = [1, 1]} : vector<8x96xbf16> to vector<8x8xbf16>
    %56 = vector.extract_strided_slice %33 {offsets = [0, 72], sizes = [8, 8], strides = [1, 1]} : vector<8x96xbf16> to vector<8x8xbf16>
    %cst_20 = arith.constant dense<0.000000e+00> : vector<8x8xf32>
    %57 = tpu.matmul %54, %55, %cst_20 {dimension_numbers = #tpu.dot_dimension_numbers<[1], [1], [0], [0], [0, 0, 1, 0], [], []>} : vector<8x8xbf16>, vector<8x8xbf16>, vector<8x8xf32> -> vector<8x8xf32>
    %cst_21 = arith.constant 0.353553385 : f32
    %58 = vector.broadcast %cst_21 : f32 to vector<8x8xf32>
    %59 = arith.mulf %57, %58 : vector<8x8xf32>
    %cst_22 = arith.constant dense<0xFF800000> : vector<8xf32>
    %60 = vector.multi_reduction <maximumf>, %59, %cst_22 [1] : vector<8x8xf32> to vector<8xf32>
    %61 = vector.shape_cast %60 : vector<8xf32> to vector<8x1xf32>
    %62 = vector.broadcast %61 : vector<8x1xf32> to vector<8x8xf32>
    %63 = arith.subf %59, %62 : vector<8x8xf32>
    %64 = math.exp %63 : vector<8x8xf32>
    %cst_23 = arith.constant dense<0.000000e+00> : vector<8xf32>
    %65 = vector.multi_reduction <add>, %64, %cst_23 [1] : vector<8x8xf32> to vector<8xf32>
    %66 = vector.shape_cast %65 : vector<8xf32> to vector<8x1xf32>
    %67 = tpu.reciprocal %66 {approx = true} : vector<8x1xf32> -> vector<8x1xf32>
    %68 = vector.broadcast %67 : vector<8x1xf32> to vector<8x8xf32>
    %69 = arith.mulf %64, %68 : vector<8x8xf32>
    %70 = arith.truncf %69 : vector<8x8xf32> to vector<8x8xbf16>
    %cst_24 = arith.constant dense<0.000000e+00> : vector<8x8xf32>
    %71 = tpu.matmul %70, %56, %cst_24 {dimension_numbers = #tpu.dot_dimension_numbers<[1], [0], [0], [1], [0, 0, 1, 1], [], []>} : vector<8x8xbf16>, vector<8x8xbf16>, vector<8x8xf32> -> vector<8x8xf32>
    %72 = arith.truncf %71 : vector<8x8xf32> to vector<8x8xbf16>
    %c0_25 = arith.constant 0 : index
    %c8 = arith.constant 8 : index
    %73 = vector.load %arg14[%c0_25, %c8] : memref<8x32xbf16, #tpu.memory_space<vmem>>, vector<8x8xbf16>
    tpu.vector_store %arg14[%c0_25, %c8], %72 {strides = array<i32>} : memref<8x32xbf16, #tpu.memory_space<vmem>>, vector<8x8xbf16>,
    %74 = vector.extract_strided_slice %33 {offsets = [0, 16], sizes = [8, 8], strides = [1, 1]} : vector<8x96xbf16> to vector<8x8xbf16>
    %75 = vector.extract_strided_slice %33 {offsets = [0, 48], sizes = [8, 8], strides = [1, 1]} : vector<8x96xbf16> to vector<8x8xbf16>
    %76 = vector.extract_strided_slice %33 {offsets = [0, 80], sizes = [8, 8], strides = [1, 1]} : vector<8x96xbf16> to vector<8x8xbf16>
    %cst_26 = arith.constant dense<0.000000e+00> : vector<8x8xf32>
    %77 = tpu.matmul %74, %75, %cst_26 {dimension_numbers = #tpu.dot_dimension_numbers<[1], [1], [0], [0], [0, 0, 1, 0], [], []>} : vector<8x8xbf16>, vector<8x8xbf16>, vector<8x8xf32> -> vector<8x8xf32>
    %cst_27 = arith.constant 0.353553385 : f32
    %78 = vector.broadcast %cst_27 : f32 to vector<8x8xf32>
    %79 = arith.mulf %77, %78 : vector<8x8xf32>
    %cst_28 = arith.constant dense<0xFF800000> : vector<8xf32>
    %80 = vector.multi_reduction <maximumf>, %79, %cst_28 [1] : vector<8x8xf32> to vector<8xf32>
    %81 = vector.shape_cast %80 : vector<8xf32> to vector<8x1xf32>
    %82 = vector.broadcast %81 : vector<8x1xf32> to vector<8x8xf32>
    %83 = arith.subf %79, %82 : vector<8x8xf32>
    %84 = math.exp %83 : vector<8x8xf32>
    %cst_29 = arith.constant dense<0.000000e+00> : vector<8xf32>
    %85 = vector.multi_reduction <add>, %84, %cst_29 [1] : vector<8x8xf32> to vector<8xf32>
    %86 = vector.shape_cast %85 : vector<8xf32> to vector<8x1xf32>
    %87 = tpu.reciprocal %86 {approx = true} : vector<8x1xf32> -> vector<8x1xf32>
    %88 = vector.broadcast %87 : vector<8x1xf32> to vector<8x8xf32>
    %89 = arith.mulf %84, %88 : vector<8x8xf32>
    %90 = arith.truncf %89 : vector<8x8xf32> to vector<8x8xbf16>
    %cst_30 = arith.constant dense<0.000000e+00> : vector<8x8xf32>
    %91 = tpu.matmul %90, %76, %cst_30 {dimension_numbers = #tpu.dot_dimension_numbers<[1], [0], [0], [1], [0, 0, 1, 1], [], []>} : vector<8x8xbf16>, vector<8x8xbf16>, vector<8x8xf32> -> vector<8x8xf32>
    %92 = arith.truncf %91 : vector<8x8xf32> to vector<8x8xbf16>
    %c0_31 = arith.constant 0 : index
    %c16 = arith.constant 16 : index
    %93 = vector.load %arg14[%c0_31, %c16] : memref<8x32xbf16, #tpu.memory_space<vmem>>, vector<8x8xbf16>
    tpu.vector_store %arg14[%c0_31, %c16], %92 {strides = array<i32>} : memref<8x32xbf16, #tpu.memory_space<vmem>>, vector<8x8xbf16>,
    %94 = vector.extract_strided_slice %33 {offsets = [0, 24], sizes = [8, 8], strides = [1, 1]} : vector<8x96xbf16> to vector<8x8xbf16>
    %95 = vector.extract_strided_slice %33 {offsets = [0, 56], sizes = [8, 8], strides = [1, 1]} : vector<8x96xbf16> to vector<8x8xbf16>
    %96 = vector.extract_strided_slice %33 {offsets = [0, 88], sizes = [8, 8], strides = [1, 1]} : vector<8x96xbf16> to vector<8x8xbf16>
    %cst_32 = arith.constant dense<0.000000e+00> : vector<8x8xf32>
    %97 = tpu.matmul %94, %95, %cst_32 {dimension_numbers = #tpu.dot_dimension_numbers<[1], [1], [0], [0], [0, 0, 1, 0], [], []>} : vector<8x8xbf16>, vector<8x8xbf16>, vector<8x8xf32> -> vector<8x8xf32>
    %cst_33 = arith.constant 0.353553385 : f32
    %98 = vector.broadcast %cst_33 : f32 to vector<8x8xf32>
    %99 = arith.mulf %97, %98 : vector<8x8xf32>
    %cst_34 = arith.constant dense<0xFF800000> : vector<8xf32>
    %100 = vector.multi_reduction <maximumf>, %99, %cst_34 [1] : vector<8x8xf32> to vector<8xf32>
    %101 = vector.shape_cast %100 : vector<8xf32> to vector<8x1xf32>
    %102 = vector.broadcast %101 : vector<8x1xf32> to vector<8x8xf32>
    %103 = arith.subf %99, %102 : vector<8x8xf32>
    %104 = math.exp %103 : vector<8x8xf32>
    %cst_35 = arith.constant dense<0.000000e+00> : vector<8xf32>
    %105 = vector.multi_reduction <add>, %104, %cst_35 [1] : vector<8x8xf32> to vector<8xf32>
    %106 = vector.shape_cast %105 : vector<8xf32> to vector<8x1xf32>
    %107 = tpu.reciprocal %106 {approx = true} : vector<8x1xf32> -> vector<8x1xf32>
    %108 = vector.broadcast %107 : vector<8x1xf32> to vector<8x8xf32>
    %109 = arith.mulf %104, %108 : vector<8x8xf32>
    %110 = arith.truncf %109 : vector<8x8xf32> to vector<8x8xbf16>
    %cst_36 = arith.constant dense<0.000000e+00> : vector<8x8xf32>
    %111 = tpu.matmul %110, %96, %cst_36 {dimension_numbers = #tpu.dot_dimension_numbers<[1], [0], [0], [1], [0, 0, 1, 1], [], []>} : vector<8x8xbf16>, vector<8x8xbf16>, vector<8x8xf32> -> vector<8x8xf32>
    %112 = arith.truncf %111 : vector<8x8xf32> to vector<8x8xbf16>
    %c0_37 = arith.constant 0 : index
    %c24 = arith.constant 24 : index
    %113 = vector.load %arg14[%c0_37, %c24] : memref<8x32xbf16, #tpu.memory_space<vmem>>, vector<8x8xbf16>
    tpu.vector_store %arg14[%c0_37, %c24], %112 {strides = array<i32>} : memref<8x32xbf16, #tpu.memory_space<vmem>>, vector<8x8xbf16>,
    %c0_38 = arith.constant 0 : index
    %c0_39 = arith.constant 0 : index
    %114 = vector.load %arg14[%c0_38, %c0_39] : memref<8x32xbf16, #tpu.memory_space<vmem>>, vector<8x32xbf16>
    %c0_40 = arith.constant 0 : index
    %c0_41 = arith.constant 0 : index
    %115 = vector.load %arg5[%c0_40, %c0_41] : memref<32x32xbf16, #tpu.memory_space<vmem>>, vector<32x32xbf16>
    %cst_42 = arith.constant dense<0.000000e+00> : vector<8x32xf32>
    %116 = tpu.matmul %114, %115, %cst_42 {dimension_numbers = #tpu.dot_dimension_numbers<[1], [0], [0], [1], [0, 0, 1, 1], [], []>} : vector<8x32xbf16>, vector<32x32xbf16>, vector<8x32xf32> -> vector<8x32xf32>
    %117 = arith.addf %1, %116 : vector<8x32xf32>
    %c0_43 = arith.constant 0 : index
    %c0_44 = arith.constant 0 : index
    %118 = vector.load %arg6[%c0_43, %c0_44] : memref<1x32xf32, #tpu.memory_space<vmem>>, vector<1x32xf32>
    %119 = vector.shape_cast %118 : vector<1x32xf32> to vector<32xf32>
    %120 = vector.shape_cast %119 : vector<32xf32> to vector<1x32xf32>
    %121 = vector.broadcast %120 : vector<1x32xf32> to vector<8x32xf32>
    %122 = arith.addf %117, %121 : vector<8x32xf32>
    %c0_45 = arith.constant 0 : index
    %c0_46 = arith.constant 0 : index
    %123 = vector.load %arg7[%c0_45, %c0_46] : memref<1x32xf32, #tpu.memory_space<vmem>>, vector<1x32xf32>
    %124 = vector.shape_cast %123 : vector<1x32xf32> to vector<32xf32>
    %c0_47 = arith.constant 0 : index
    %c0_48 = arith.constant 0 : index
    %125 = vector.load %arg8[%c0_47, %c0_48] : memref<1x32xf32, #tpu.memory_space<vmem>>, vector<1x32xf32>
    %126 = vector.shape_cast %125 : vector<1x32xf32> to vector<32xf32>
    %cst_49 = arith.constant dense<0.000000e+00> : vector<8xf32>
    %127 = vector.multi_reduction <add>, %122, %cst_49 [1] : vector<8x32xf32> to vector<8xf32>
    %128 = vector.shape_cast %127 : vector<8xf32> to vector<8x1xf32>
    %cst_50 = arith.constant 3.200000e+01 : f32
    %129 = vector.broadcast %cst_50 : f32 to vector<8x1xf32>
    %130 = arith.divf %128, %129 : vector<8x1xf32>
    %131 = vector.broadcast %130 : vector<8x1xf32> to vector<8x32xf32>
    %132 = arith.subf %122, %131 : vector<8x32xf32>
    %133 = arith.mulf %132, %132 : vector<8x32xf32>
    %cst_51 = arith.constant dense<0.000000e+00> : vector<8xf32>
    %134 = vector.multi_reduction <add>, %133, %cst_51 [1] : vector<8x32xf32> to vector<8xf32>
    %135 = vector.shape_cast %134 : vector<8xf32> to vector<8x1xf32>
    %cst_52 = arith.constant 3.200000e+01 : f32
    %136 = vector.broadcast %cst_52 : f32 to vector<8x1xf32>
    %137 = arith.divf %135, %136 : vector<8x1xf32>
    %138 = vector.broadcast %130 : vector<8x1xf32> to vector<8x32xf32>
    %139 = arith.subf %122, %138 : vector<8x32xf32>
    %cst_53 = arith.constant 9.99999974E-6 : f32
    %140 = vector.broadcast %cst_53 : f32 to vector<8x1xf32>
    %141 = arith.addf %137, %140 : vector<8x1xf32>
    %142 = math.rsqrt %141 : vector<8x1xf32>
    %143 = vector.broadcast %142 : vector<8x1xf32> to vector<8x32xf32>
    %144 = arith.mulf %139, %143 : vector<8x32xf32>
    %145 = vector.shape_cast %124 : vector<32xf32> to vector<1x32xf32>
    %146 = vector.broadcast %145 : vector<1x32xf32> to vector<8x32xf32>
    %147 = arith.mulf %144, %146 : vector<8x32xf32>
    %148 = vector.shape_cast %126 : vector<32xf32> to vector<1x32xf32>
    %149 = vector.broadcast %148 : vector<1x32xf32> to vector<8x32xf32>
    %150 = arith.addf %147, %149 : vector<8x32xf32>
    %151 = arith.truncf %150 : vector<8x32xf32> to vector<8x32xbf16>
    %c0_54 = arith.constant 0 : index
    %c0_55 = arith.constant 0 : index
    %152 = vector.load %arg9[%c0_54, %c0_55] : memref<32x128xbf16, #tpu.memory_space<vmem>>, vector<32x128xbf16>
    %cst_56 = arith.constant dense<0.000000e+00> : vector<8x128xf32>
    %153 = tpu.matmul %151, %152, %cst_56 {dimension_numbers = #tpu.dot_dimension_numbers<[1], [0], [0], [1], [0, 0, 1, 1], [], []>} : vector<8x32xbf16>, vector<32x128xbf16>, vector<8x128xf32> -> vector<8x128xf32>
    %c0_57 = arith.constant 0 : index
    %c0_58 = arith.constant 0 : index
    %154 = vector.load %arg10[%c0_57, %c0_58] : memref<1x128xf32, #tpu.memory_space<vmem>>, vector<1x128xf32>
    %155 = vector.shape_cast %154 : vector<1x128xf32> to vector<128xf32>
    %156 = vector.shape_cast %155 : vector<128xf32> to vector<1x128xf32>
    %157 = vector.broadcast %156 : vector<1x128xf32> to vector<8x128xf32>
    %158 = arith.addf %153, %157 : vector<8x128xf32>
    %cst_59 = arith.constant 5.000000e-01 : f32
    %159 = vector.broadcast %cst_59 : f32 to vector<8x128xf32>
    %160 = arith.mulf %159, %158 : vector<8x128xf32>
    %cst_60 = arith.constant 0.707106769 : f32
    %161 = vector.broadcast %cst_60 : f32 to vector<8x128xf32>
    %162 = arith.mulf %158, %161 : vector<8x128xf32>
    %cst_61 = arith.constant 0.000000e+00 : f32
    %163 = vector.broadcast %cst_61 : f32 to vector<8x128xf32>
    %164 = arith.cmpf oge, %162, %163 : vector<8x128xf32>
    %cst_62 = arith.constant 1.000000e+00 : f32
    %cst_63 = arith.constant -1.000000e+00 : f32
    %165 = vector.broadcast %cst_62 : f32 to vector<8x128xf32>
    %166 = vector.broadcast %cst_63 : f32 to vector<8x128xf32>
    %167 = arith.select %164, %165, %166 : vector<8x128xi1>, vector<8x128xf32>
    %168 = math.absf %162 : vector<8x128xf32>
    %cst_64 = arith.constant 0.327591091 : f32
    %169 = vector.broadcast %cst_64 : f32 to vector<8x128xf32>
    %170 = arith.mulf %169, %168 : vector<8x128xf32>
    %cst_65 = arith.constant 1.000000e+00 : f32
    %171 = vector.broadcast %cst_65 : f32 to vector<8x128xf32>
    %172 = arith.addf %171, %170 : vector<8x128xf32>
    %cst_66 = arith.constant 1.000000e+00 : f32
    %173 = vector.broadcast %cst_66 : f32 to vector<8x128xf32>
    %174 = arith.divf %173, %172 : vector<8x128xf32>
    %cst_67 = arith.constant 1.06140542 : f32
    %175 = vector.broadcast %cst_67 : f32 to vector<8x128xf32>
    %176 = arith.mulf %175, %174 : vector<8x128xf32>
    %cst_68 = arith.constant -1.45315206 : f32
    %177 = vector.broadcast %cst_68 : f32 to vector<8x128xf32>
    %178 = arith.addf %176, %177 : vector<8x128xf32>
    %179 = arith.mulf %178, %174 : vector<8x128xf32>
    %cst_69 = arith.constant 1.42141378 : f32
    %180 = vector.broadcast %cst_69 : f32 to vector<8x128xf32>
    %181 = arith.addf %179, %180 : vector<8x128xf32>
    %182 = arith.mulf %181, %174 : vector<8x128xf32>
    %cst_70 = arith.constant -0.284496725 : f32
    %183 = vector.broadcast %cst_70 : f32 to vector<8x128xf32>
    %184 = arith.addf %182, %183 : vector<8x128xf32>
    %185 = arith.mulf %184, %174 : vector<8x128xf32>
    %cst_71 = arith.constant 0.254829586 : f32
    %186 = vector.broadcast %cst_71 : f32 to vector<8x128xf32>
    %187 = arith.addf %185, %186 : vector<8x128xf32>
    %188 = arith.mulf %187, %174 : vector<8x128xf32>
    %cst_72 = arith.constant 0.000000e+00 : f32
    %189 = vector.broadcast %cst_72 : f32 to vector<8x128xf32>
    %190 = arith.subf %189, %168 : vector<8x128xf32>
    %191 = arith.mulf %190, %168 : vector<8x128xf32>
    %192 = math.exp %191 : vector<8x128xf32>
    %193 = arith.mulf %188, %192 : vector<8x128xf32>
    %cst_73 = arith.constant 1.000000e+00 : f32
    %194 = vector.broadcast %cst_73 : f32 to vector<8x128xf32>
    %195 = arith.subf %194, %193 : vector<8x128xf32>
    %196 = arith.mulf %167, %195 : vector<8x128xf32>
    %cst_74 = arith.constant 1.000000e+00 : f32
    %197 = vector.broadcast %cst_74 : f32 to vector<8x128xf32>
    %198 = arith.addf %197, %196 : vector<8x128xf32>
    %199 = arith.mulf %160, %198 : vector<8x128xf32>
    %200 = arith.truncf %199 : vector<8x128xf32> to vector<8x128xbf16>
    %c0_75 = arith.constant 0 : index
    %c0_76 = arith.constant 0 : index
    %201 = vector.load %arg11[%c0_75, %c0_76] : memref<128x32xbf16, #tpu.memory_space<vmem>>, vector<128x32xbf16>
    %cst_77 = arith.constant dense<0.000000e+00> : vector<8x32xf32>
    %202 = tpu.matmul %200, %201, %cst_77 {dimension_numbers = #tpu.dot_dimension_numbers<[1], [0], [0], [1], [0, 0, 1, 1], [], []>} : vector<8x128xbf16>, vector<128x32xbf16>, vector<8x32xf32> -> vector<8x32xf32>
    %c0_78 = arith.constant 0 : index
    %c0_79 = arith.constant 0 : index
    %203 = vector.load %arg12[%c0_78, %c0_79] : memref<1x32xf32, #tpu.memory_space<vmem>>, vector<1x32xf32>
    %204 = vector.shape_cast %203 : vector<1x32xf32> to vector<32xf32>
    %205 = vector.shape_cast %204 : vector<32xf32> to vector<1x32xf32>
    %206 = vector.broadcast %205 : vector<1x32xf32> to vector<8x32xf32>
    %207 = arith.addf %202, %206 : vector<8x32xf32>
    %208 = arith.addf %122, %207 : vector<8x32xf32>
    %c0_80 = arith.constant 0 : index
    %c0_81 = arith.constant 0 : index
    %c0_82 = arith.constant 0 : index
    %209 = vector.load %arg13[%c0_80, %c0_81, %c0_82] : memref<1x8x32xf32, #tpu.memory_space<vmem>>, vector<1x8x32xf32>
    %210 = vector.shape_cast %209 : vector<1x8x32xf32> to vector<8x32xf32>
    %211 = vector.shape_cast %208 : vector<8x32xf32> to vector<1x8x32xf32>
    tpu.vector_store %arg13[%c0_80, %c0_81, %c0_82], %211 {strides = array<i32>} : memref<1x8x32xf32, #tpu.memory_space<vmem>>, vector<1x8x32xf32>,
    return
  }
  func.func @transform_0(%arg0: i32) -> (i32, i32, i32) {
    %c0_i32 = arith.constant 0 : i32
    %c0_i32_0 = arith.constant 0 : i32
    %c0_i32_1 = arith.constant 0 : i32
    return %arg0, %c0_i32, %c0_i32_0 : i32, i32, i32
  }
  func.func @transform_1(%arg0: i32) -> (i32, i32) {
    %c0_i32 = arith.constant 0 : i32
    %c0_i32_0 = arith.constant 0 : i32
    %c0_i32_1 = arith.constant 0 : i32
    return %c0_i32, %c0_i32_0 : i32, i32
  }
  func.func @transform_2(%arg0: i32) -> (i32, i32) {
    %c0_i32 = arith.constant 0 : i32
    %c0_i32_0 = arith.constant 0 : i32
    %c0_i32_1 = arith.constant 0 : i32
    return %c0_i32, %c0_i32_0 : i32, i32
  }
  func.func @transform_3(%arg0: i32) -> (i32, i32) {
    %c0_i32 = arith.constant 0 : i32
    %c0_i32_0 = arith.constant 0 : i32
    %c0_i32_1 = arith.constant 0 : i32
    return %c0_i32, %c0_i32_0 : i32, i32
  }
  func.func @transform_4(%arg0: i32) -> (i32, i32) {
    %c0_i32 = arith.constant 0 : i32
    %c0_i32_0 = arith.constant 0 : i32
    %c0_i32_1 = arith.constant 0 : i32
    return %c0_i32, %c0_i32_0 : i32, i32
  }
  func.func @transform_5(%arg0: i32) -> (i32, i32) {
    %c0_i32 = arith.constant 0 : i32
    %c0_i32_0 = arith.constant 0 : i32
    %c0_i32_1 = arith.constant 0 : i32
    return %c0_i32, %c0_i32_0 : i32, i32
  }
  func.func @transform_6(%arg0: i32) -> (i32, i32) {
    %c0_i32 = arith.constant 0 : i32
    %c0_i32_0 = arith.constant 0 : i32
    %c0_i32_1 = arith.constant 0 : i32
    return %c0_i32, %c0_i32_0 : i32, i32
  }
  func.func @transform_7(%arg0: i32) -> (i32, i32) {
    %c0_i32 = arith.constant 0 : i32
    %c0_i32_0 = arith.constant 0 : i32
    %c0_i32_1 = arith.constant 0 : i32
    return %c0_i32, %c0_i32_0 : i32, i32
  }
  func.func @transform_8(%arg0: i32) -> (i32, i32) {
    %c0_i32 = arith.constant 0 : i32
    %c0_i32_0 = arith.constant 0 : i32
    %c0_i32_1 = arith.constant 0 : i32
    return %c0_i32, %c0_i32_0 : i32, i32
  }
  func.func @transform_9(%arg0: i32) -> (i32, i32) {
    %c0_i32 = arith.constant 0 : i32
    %c0_i32_0 = arith.constant 0 : i32
    %c0_i32_1 = arith.constant 0 : i32
    return %c0_i32, %c0_i32_0 : i32, i32
  }
  func.func @transform_10(%arg0: i32) -> (i32, i32) {
    %c0_i32 = arith.constant 0 : i32
    %c0_i32_0 = arith.constant 0 : i32
    %c0_i32_1 = arith.constant 0 : i32
    return %c0_i32, %c0_i32_0 : i32, i32
  }
  func.func @transform_11(%arg0: i32) -> (i32, i32) {
    %c0_i32 = arith.constant 0 : i32
    %c0_i32_0 = arith.constant 0 : i32
    %c0_i32_1 = arith.constant 0 : i32
    return %c0_i32, %c0_i32_0 : i32, i32
  }
  func.func @transform_12(%arg0: i32) -> (i32, i32, i32) {
    %c0_i32 = arith.constant 0 : i32
    %c0_i32_0 = arith.constant 0 : i32
    %c0_i32_1 = arith.constant 0 : i32
    return %arg0, %c0_i32, %c0_i32_0 : i32, i32, i32
  }
}

</mosaic_0001>

<bundles_post_ra>
// kernel: tpu_custom_call.1
= control target key start
LH: loop header
LB: loop body
LE: loop exit
PB: predicated region body
PF: predicated region fallthrough
CT: control target
= control target key end

     0   :  { %s1580_s0 = inlined_call_operand.vmem [shape: f32[2,8,32], index: 0, kind: input, shape index: {}]   ;;  %s1581_s1 = inlined_call_operand.vmem [shape: f32[1,32], index: 1, kind: input, shape index: {}]   ;;  %s1582_s2 = inlined_call_operand.vmem [shape: f32[1,32], index: 2, kind: input, shape index: {}]   ;;  %s1583_s3 = inlined_call_operand.vmem [shape: bf16[32,96], index: 3, kind: input, shape index: {}]   ;;  %s1584_s4 = inlined_call_operand.vmem [shape: bf16[32,32], index: 4, kind: input, shape index: {}]   ;;  %s1585_s5 = inlined_call_operand.vmem [shape: f32[1,32], index: 5, kind: input, shape index: {}]   ;;  %s1586_s6 = inlined_call_operand.vmem [shape: f32[1,32], index: 6, kind: input, shape index: {}]   ;;  %s1587_s7 = inlined_call_operand.vmem [shape: f32[1,32], index: 7, kind: input, shape index: {}]   ;;  %s1588_s8 = inlined_call_operand.vmem [shape: bf16[32,128], index: 8, kind: input, shape index: {}]   ;;  %s1589_s9 = inlined_call_operand.vmem [shape: f32[1,128], index: 9, kind: input, shape index: {}]   ;;  %s1590_s10 = inlined_call_operand.vmem [shape: bf16[128,32], index: 10, kind: input, shape index: {}]   ;;  %s1591_s11 = inlined_call_operand.vmem [shape: f32[1,32], index: 11, kind: input, shape index: {}]   ;;  %s1592_s12 = inlined_call_operand.hbm [shape: f32[2,8,32], index: 12, kind: output, shape index: {}]  }
   0x1   :  { %1593 = sst [smem:[#allocation6_spill]] %s1580_s0 }
   0x2   :  { %1594 = sst [smem:[#allocation7_spill]] %s1581_s1 }
   0x3   :  { %1595 = sst [smem:[#allocation8_spill]] %s1582_s2 }
   0x4   :  { %17 = vsyncpa [#allocation4], 0 }
   0x5   :  { %19 = vsyncpa [#allocation4 + $0x1], 0  ;;  %s1371_s21 = smov 0   ;;  %s1373_s22 = smov 0  }
   0x6   :  { %s1375_s23 = smov 0   ;;  %s1377_s24 = smov 0  }
   0x7 LB: > { %s1392_s25 = sadd.s32 4294967295, %s1288_s24   ;;  %s1047_s26 = sadd.s32 4294967294, %s1288_s24   ;;  %s1288_s24 = sphi %s1377_s24, %s1604_s24   ;;  %s1284_s23 = sphi %s1375_s23, %s1603_s23   ;;  %s1280_s22 = sphi %s1373_s22, %s1602_s22   ;;  %s1276_s21 = sphi %s1371_s21, %s1601_s21  }
   0x8   : > { %s1396_s27 = sadd.s32 1, %s1288_s24   ;;  %s289_s28 = sadd.s32 1, %s1284_s23 }
   0x9   : > { %s286_s29 = ssub.s32 %s1288_s24, %s1396_s27  ;;  %p299_p0 = scmp.ne.s32.totalorder %s1284_s23, %s1280_s22 }
   0xa   : > { %p287_p1 = scmp.eq.s32.totalorder %s286_s29, 0  ;;  %p300_p2 = scmp.eq.s32.totalorder %s1392_s25, 1 }
   0xb   : > { %p305_p3 = scmp.ne.s32.totalorder %s1280_s22, %s1276_s21  ;;  %p306_p4 = scmp.eq.s32.totalorder %s1047_s26, 1 }
   0xc   : > { %s1407_s30 = scalar_select %p287_p1, %s1284_s23, %s289_s28  }
   0xd   : > { %p1409_p5 = por %p300_p2, %p299_p0  ;;  %p1413_p6 = por %p306_p4, %p305_p3 }
   0xe   : > { %p1050_p7 = scmp.ge.s32.totalorder %s1288_s24, 1  ;;  %p364_p8 = scmp.lt.s32.totalorder %s1288_s24, 3 }
  0x10   : > { %p365_p9 = pnand %p1050_p7, %p364_p8 }
  0x11   : > { %p405_p10 = scmp.lt.s32.totalorder (!%p365_p9), %s1392_s25, 1  ;;  %s1598_s0 = sld [smem:[#allocation6_spill]] (!%p365_p9) }
  0x12   : > { %368 = sbr.rel (%p365_p9) target bundleno = 2367 (0x93f), region = 68  ;;  %s1599_s1 = sld [smem:[#allocation7_spill]] (!%p365_p9) }
  0x13   : > { %s1600_s2 = sld [smem:[#allocation8_spill]] (!%p365_p9)  ;;  %s1292_s20 = smov (!%p365_p9), 64  }
  0x14   : > { %s1293_s26 = smov (!%p365_p9), 96   ;;  %s1294_s28 = smov (!%p365_p9), 72  }
  0x15   : > { %s1295_s29 = smov (!%p365_p9), 80   ;;  %s1298_s17 = smov (!%p365_p9), 112  }
  0x16   : > { %s1299_s18 = smov (!%p365_p9), 40  }
  0x17   : > { %s406_s15 = scalar_select %p405_p10, %s1392_s25, 1  ;;  %vm413_vm0 = vcmask 261120   ;;  %v1290_v2 = vmov 32.0   ;;  %v1125_v14 = vld [vmem:[%s1583_s3 + $0x8] sm:$0xff]  ;;  %v1124_v15 = vld [vmem:[%s1583_s3] sm:$0xff]  ;;  %vm528_vm5 = vcmask 1043456  }
  0x18   : > { %1200 = vrcp.f32 %v1290_v2  ;;  %477 = vmatpush.bf16.msra.mxu0 %v1125_v14  ;;  %v1193_v25 = vld [vmem:[%s1599_s1] ss:$0 sm:$0xff]  ;;  %vm490_vm6 = vcmask 64512   ;;  %vm546_vm7 = vcmask 60416   ;;  %vm610_vm8 = vcmask 126016  }
  0x19   : > { %s1052_s16 = sshll.u32 %s406_s15, 3  ;;  %v1194_v28 = vld [vmem:[%s1600_s2] ss:$0 sm:$0xff]  ;;  %s1296_s15 = smov 120   ;;  %vm674_vm9 = vcmask 191616   ;;  %vm738_vm10 = vcmask 257216  }
  0x1a   : > { %s408_s19 = scalar_lea.vmem %s1598_s0, %s1052_s16  ;;  %s1297_s16 = smov 104  }
  0x1b   : > { %v1424_v0 = vld [vmem:[%s408_s19] sm:$0xff]  ;;  %s1291_s19 = smov 88  }
  0x1c   : > { %v414_v1 = vsel %vm413_vm0, %v1424_v0, 0.0  ;;  %478 = vmatpush.bf16.msra.mxu0 %v1124_v15 }
  0x1d   : > { %415 = vadd.xlane.f32.xlu0 %v414_v1 }
  0x1e   : > { %v1201_v3 = vpop.eup %1200 }
  0x1f   : > { %v418_v4 = vmul.f32 32.0, %v1201_v3  ;;  %vm422_vm1 = vweird.f32 %v1201_v3 }
  0x21   : > { %v419_v5 = vsub.f32 1.0, %v418_v4 }
  0x23   : > { %v420_v6 = vmul.f32 %v1201_v3, %v419_v5 }
  0x25   : > { %v421_v7 = vadd.f32 %v1201_v3, %v420_v6 }
  0x27   : > { %v1428_v8 = vsel %vm422_vm1, %v1201_v3, %v421_v7 }
  0x90   : > { %v416_v9 = vpop.xlane.xlu0 %415 }
  0x91   : > { %v424_v10 = vmul.f32 %v1428_v8, %v416_v9 }
  0x93   : > { %v425_v11 = vsub.f32 %v1424_v0, %v424_v10 }
  0x95   : > { %v426_v12 = vmul.f32 %v425_v11, %v425_v11 }
  0x97   : > { %v427_v13 = vsel %vm413_vm0, %v426_v12, 0.0 }
  0x98   : > { %428 = vadd.xlane.f32.xlu0 %v427_v13 }
 0x10b   : > { %v429_v16 = vpop.xlane.xlu0 %428 }
 0x10c   : > { %v430_v17 = vmul.f32 %v429_v16, %v1428_v8 }
 0x10e   : > { %v431_v18 = vadd.f32 1e-05, %v430_v17 }
 0x110   : > { %1202 = vrsqrt.f32 %v431_v18  ;;  %vm438_vm3 = vweird.f32 %v431_v18 }
 0x116   : > { %v1203_v19 = vpop.eup %1202 }
 0x117   : > { %v433_v20 = vmul.f32 %v1203_v19, %v431_v18  ;;  %vm439_vm2 = vweird.f32 %v1203_v19 }
 0x118   : > { %vm440_vm4 = vmor %vm438_vm3, %vm439_vm2 }
 0x119   : > { %v434_v21 = vmul.f32 %v1203_v19, %v433_v20 }
 0x11b   : > { %v435_v22 = vmul.f32 0.5, %v434_v21 }
 0x11d   : > { %v436_v23 = vsub.f32 1.5, %v435_v22 }
 0x11f   : > { %v437_v24 = vmul.f32 %v1203_v19, %v436_v23 }
 0x121   : > { %v441_v26 = vsel %vm440_vm4, %v1203_v19, %v437_v24 }
 0x122   : > { %v442_v27 = vmul.f32 %v441_v26, %v425_v11 }
 0x124   : > { %v446_v29 = vmul.f32 %v1193_v25, %v442_v27 }
 0x126   : > { %v450_v30 = vadd.f32 %v1194_v28, %v446_v29 }
 0x128   : > { %v451_v31 = vpack.c.bf16 %v450_v30, %v450_v30 }
 0x12a   : > { %1061 = vmatmul.msk.bf16.vlgmr.msra.gmra.mxu0 %vm413_vm0, %v451_v31 }
 0x1a7   : > { %v480_v32 = vpop.f32.mrf.mxu0 }
 0x1a8   : > { %v484_v33 = vpack.c.bf16 %v480_v32, %v480_v32 }
 0x1aa   : > { %v486_v34 = vunpack.c.l.b16 %v484_v33 }
 0x1ac   : > { %v1447_v35 = vpack.c.b16 %v486_v34, %v486_v34 }
 0x1ae   : > { %550 = vrot.lane.b32.xlu0 %v1447_v35, %s1291_s19  ;;  %523 = vrot.lane.b32.xlu2 %v1447_v35, %s1292_s20  ;;  %s1300_s19 = smov 48   ;;  %s1301_s20 = smov 56  }
 0x1af   : > { %488 = vrot.lane.b32.xlu1 %v1447_v35, %s1293_s26  ;;  %v482_v36 = vpop.f32.mrf.mxu0  ;;  %s1302_s26 = smov 16  }
 0x1b6   : > { %678 = vrot.lane.b32.xlu0 %v1447_v35, %s1294_s28  ;;  %s1303_s28 = smov 8  }
 0x1be   : > { %614 = vrot.lane.b32.xlu0 %v1447_v35, %s1295_s29  ;;  %s1304_s29 = smov 24  }
 0x208   : > { %v524_v37 = vpop.permute.xlu2 %523 }
 0x209   : > { %v530_v38 = vsel %vm528_vm5, %v524_v37, 0 }
 0x20a   : > { %539 = vmatpush.bf16.msra.mxu2 %v530_v38 }
 0x220   : > { %v551_v39 = vpop.permute.xlu0 %550 }
 0x221   : > { %v489_v40 = vpop.permute.xlu1 %488  ;;  %v556_v41 = vsel %vm490_vm6, %v551_v39, 0 }
 0x222   : > { %v495_v42 = vsel %vm490_vm6, %v489_v40, 0  ;;  %565 = vmatpush.bf16.xpose.msrb.mxu2 %v556_v41 }
 0x223   : > { %504 = vmatpush.bf16.xpose.msra.mxu1 %v495_v42 }
 0x228   : > { %v679_v43 = vpop.permute.xlu0 %678 }
 0x229   : > { %v684_v44 = vsel %vm490_vm6, %v679_v43, 0 }
 0x22a   : > { %1062 = vmatmul.msk.bf16.vlgmr.msra.gmra.mxu1 %vm490_vm6, %v484_v33  ;;  %693 = vmatpush.bf16.xpose.msra.mxu3 %v684_v44 }
 0x230   : > { %v615_v45 = vpop.permute.xlu0 %614 }
 0x231   : > { %v620_v46 = vsel %vm490_vm6, %v615_v45, 0 }
 0x232   : > { %629 = vmatpush.bf16.xpose.msrb.mxu0 %v620_v46 }
 0x2a7   : > { %v506_v47 = vpop.f32.mrf.mxu1 }
 0x2a8   : > { %v510_v48 = vmul.f32 0.35355338, %v506_v47 }
 0x2aa   : > { %v511_v49 = vsel %vm490_vm6, %v510_v48, -inf }
 0x2ab   : > { %512 = vmax.xlane.f32.xlu1 %v511_v49 }
 0x2af   : > { %v508_v50 = vpop.f32.mrf.mxu1 }
 0x31e   : > { %v513_v51 = vpop.xlane.xlu1 %512 }
 0x31f   : > { %v514_v52 = vsub.f32 %v510_v48, %v513_v51 }
 0x321   : > { %v515_v53 = vmul.f32 1.442695, %v514_v52 }
 0x323   : > { %1204 = vpow2.f32 %v515_v53 }
 0x329   : > { %v1205_v54 = vpop.eup %1204 }
 0x32a   : > { %v517_v55 = vsel %vm490_vm6, %v1205_v54, 0.0 }
 0x32b   : > { %518 = vadd.xlane.f32.xlu2 %v517_v55 }
 0x343   : > { %548 = vrot.lane.b32.xlu2 %v1447_v35, %s1296_s15 }
 0x34b   : > { %676 = vrot.lane.b32.xlu2 %v1447_v35, %s1297_s16 }
 0x353   : > { %612 = vrot.lane.b32.xlu2 %v1447_v35, %s1298_s17 }
 0x39e   : > { %v519_v56 = vpop.xlane.xlu2 %518 }
 0x39f   : > { %1206 = vrcp.f32 %v519_v56 }
 0x3a5   : > { %v1207_v57 = vpop.eup %1206 }
 0x3a6   : > { %v549_v58 = vpop.permute.xlu2 %548  ;;  %v521_v59 = vmul.f32 %v1207_v57, %v1205_v54 }
 0x3a8   : > { %v522_v60 = vpack.c.bf16 %v521_v59, %v521_v59 }
 0x3aa   : > { %1063 = vmatmul.msk.bf16.vlgmr.msra.gmra.mxu2 %vm490_vm6, %v522_v60 }
 0x3ae   : > { %v677_v61 = vpop.permute.xlu2 %676 }
 0x3af   : > { %1068 = vmatmul.msk.bf16.vlgmr.msra.gmra.mxu3 %vm490_vm6, %v677_v61  ;;  %v1126_v61 = vld [vmem:[%s1584_s4] sm:$0xff] }
 0x3b6   : > { %v613_v62 = vpop.permute.xlu2 %612 }
 0x3b7   : > { %1066 = vmatmul.msk.bf16.vlgmr.msrb.gmra.mxu0 %vm490_vm6, %v613_v62 }
 0x3ba   : > { %1064 = vmatmul.msk.bf16.vlgmr.msrb.gmra.mxu2 %vm490_vm6, %v549_v58  ;;  %v1127_v58 = vld [vmem:[%s1584_s4 + $0x8] sm:$0xff] }
 0x3bb   : > { %766 = vmatpush.bf16.msra.mxu0 %v1127_v58 }
 0x3bf   : > { %767 = vmatpush.bf16.msra.mxu0 %v1126_v61 }
 0x42d   : > { %v541_v63 = vpop.f32.mrf.mxu2 }
 0x42e   : > { %v545_v1 = vpack.c.bf16 %v541_v63, %v541_v63 }
 0x430   : > { %547 = vst.msk [vmem:[#allocation2] sm:$0xf] %vm546_vm7, %v545_v1  ;;  %v1195_v1 = vld [vmem:[%s1585_s5] ss:$0 sm:$0xff] }
 0x432   : > { %v695_v2 = vpop.f32.mrf.mxu3 }
 0x433   : > { %v699_v3 = vmul.f32 0.35355338, %v695_v2 }
 0x434   : > { %v631_v4 = vpop.f32.mrf.mxu0 }
 0x435   : > { %v635_v5 = vmul.f32 0.35355338, %v631_v4  ;;  %v543_v6 = vpop.f32.mrf.mxu2  ;;  %v700_v7 = vsel %vm490_vm6, %v699_v3, -inf }
 0x436   : > { %701 = vmax.xlane.f32.xlu0 %v700_v7 }
 0x437   : > { %v636_v9 = vsel %vm490_vm6, %v635_v5, -inf }
 0x438   : > { %637 = vmax.xlane.f32.xlu2 %v636_v9 }
 0x43a   : > { %v697_v10 = vpop.f32.mrf.mxu3 }
 0x43c   : > { %v633_v11 = vpop.f32.mrf.mxu0 }
 0x43d   : > { %v567_v12 = vpop.f32.mrf.mxu2 }
 0x43e   : > { %v571_v13 = vmul.f32 0.35355338, %v567_v12 }
 0x440   : > { %v572_v14 = vsel %vm490_vm6, %v571_v13, -inf }
 0x441   : > { %573 = vmax.xlane.f32.xlu1 %v572_v14 }
 0x445   : > { %v569_v15 = vpop.f32.mrf.mxu2 }
 0x450   : > { %712 = vrot.lane.b32.xlu2 %v1447_v35, %s1299_s18 }
 0x4a9   : > { %v702_v26 = vpop.xlane.xlu0 %701 }
 0x4aa   : > { %v703_v27 = vsub.f32 %v699_v3, %v702_v26 }
 0x4ab   : > { %v638_v16 = vpop.xlane.xlu2 %637 }
 0x4ac   : > { %v639_v17 = vsub.f32 %v635_v5, %v638_v16  ;;  %v704_v28 = vmul.f32 1.442695, %v703_v27 }
 0x4ae   : > { %v640_v18 = vmul.f32 1.442695, %v639_v17 }
 0x4b0   : > { %1208 = vpow2.f32 %v640_v18 }
 0x4b3   : > { %v713_v39 = vpop.permute.xlu2 %712 }
 0x4b4   : > { %v574_v19 = vpop.xlane.xlu1 %573  ;;  %v718_v43 = vsel %vm528_vm5, %v713_v39, 0 }
 0x4b5   : > { %v575_v20 = vsub.f32 %v571_v13, %v574_v19  ;;  %v1128_v13 = vld [vmem:[%s1588_s8] sm:$0xff] }
 0x4b6   : > { %v1209_v21 = vpop.eup %1208 }
 0x4b7   : > { %v576_v22 = vmul.f32 1.442695, %v575_v20  ;;  %v642_v23 = vsel %vm490_vm6, %v1209_v21, 0.0 }
 0x4b8   : > { %643 = vadd.xlane.f32.xlu0 %v642_v23  ;;  %v1196_v23 = vld [vmem:[%s1586_s6] ss:$0 sm:$0xff] }
 0x4b9   : > { %1210 = vpow2.f32 %v576_v22 }
 0x4ba   : > { %1212 = vpow2.f32 %v704_v28 }
 0x4bf   : > { %v1211_v24 = vpop.eup %1210 }
 0x4c0   : > { %v578_v25 = vsel %vm490_vm6, %v1211_v24, 0.0  ;;  %v1213_v29 = vpop.eup %1212 }
 0x4c1   : > { %579 = vadd.xlane.f32.xlu1 %v578_v25  ;;  %v706_v30 = vsel %vm490_vm6, %v1213_v29, 0.0 }
 0x4cc   : > { %648 = vrot.lane.b32.xlu0 %v1447_v35, %s1300_s19 }
 0x4da   : > { %584 = vrot.lane.b32.xlu1 %v1447_v35, %s1301_s20  ;;  %s402_s20 = sand.u32 1, %s1280_s22  }
 0x504   : > { %707 = vadd.xlane.f32.xlu1 %v706_v30  ;;  %v1198_v30 = vld [vmem:[%s1589_s9] ss:$0 sm:$0xff] }
 0x52b   : > { %v644_v31 = vpop.xlane.xlu0 %643 }
 0x52c   : > { %1214 = vrcp.f32 %v644_v31  ;;  %v1136_v31 = vld [vmem:[%s1590_s10 + $0x30] sm:$0xff] }
 0x532   : > { %v1215_v32 = vpop.eup %1214 }
 0x533   : > { %v646_v33 = vmul.f32 %v1215_v32, %v1209_v21 }
 0x534   : > { %v580_v36 = vpop.xlane.xlu1 %579 }
 0x535   : > { %v647_v38 = vpack.c.bf16 %v646_v33, %v646_v33  ;;  %1216 = vrcp.f32 %v580_v36 }
 0x53b   : > { %v1217_v35 = vpop.eup %1216 }
 0x53c   : > { %v582_v40 = vmul.f32 %v1217_v35, %v1211_v24 }
 0x53e   : > { %v649_v34 = vpop.permute.xlu0 %648  ;;  %v583_v44 = vpack.c.bf16 %v582_v40, %v582_v40 }
 0x53f   : > { %v654_v37 = vsel %vm528_vm5, %v649_v34, 0  ;;  %v1135_v34 = vld [vmem:[%s1590_s10 + $0x28] sm:$0xff] }
 0x540   : > { %663 = vmatpush.bf16.msrb.mxu1 %v654_v37 }
 0x543   : > { %1067 = vmatmul.msk.bf16.vlgmr.msrb.gmra.mxu1 %vm490_vm6, %v647_v38  ;;  %v1134_v38 = vld [vmem:[%s1590_s10 + $0x20] sm:$0xff] }
 0x54c   : > { %v585_v41 = vpop.permute.xlu1 %584 }
 0x54d   : > { %v590_v42 = vsel %vm528_vm5, %v585_v41, 0  ;;  %v1133_v41 = vld [vmem:[%s1590_s10 + $0x18] sm:$0xff] }
 0x54e   : > { %599 = vmatpush.bf16.msra.mxu2 %v590_v42  ;;  %v1132_v42 = vld [vmem:[%s1590_s10 + $0x10] sm:$0xff] }
 0x551   : > { %1065 = vmatmul.msk.bf16.vlgmr.msra.gmra.mxu2 %vm490_vm6, %v583_v44 }
 0x552   : > { %727 = vmatpush.bf16.msrb.mxu2 %v718_v43 }
 0x577   : > { %v708_v45 = vpop.xlane.xlu1 %707 }
 0x578   : > { %1218 = vrcp.f32 %v708_v45  ;;  %v1131_v45 = vld [vmem:[%s1590_s10 + $0x8] sm:$0xff] }
 0x57e   : > { %v1219_v46 = vpop.eup %1218 }
 0x57f   : > { %v710_v47 = vmul.f32 %v1219_v46, %v1213_v29  ;;  %v1137_v29 = vld [vmem:[%s1590_s10 + $0x38] sm:$0xff] }
 0x580   : > { %957 = vmatpush.bf16.msrb.mxu3 %v1137_v29 }
 0x581   : > { %v711_v48 = vpack.c.bf16 %v710_v47, %v710_v47  ;;  %v1130_v47 = vld [vmem:[%s1590_s10] sm:$0xff] }
 0x583   : > { %1069 = vmatmul.msk.bf16.vlgmr.msrb.gmra.mxu2 %vm490_vm6, %v711_v48 }
 0x584   : > { %958 = vmatpush.bf16.msrb.mxu3 %v1136_v31 }
 0x588   : > { %959 = vmatpush.bf16.msrb.mxu3 %v1135_v34 }
 0x58c   : > { %960 = vmatpush.bf16.msrb.mxu3 %v1134_v38 }
 0x590   : > { %961 = vmatpush.bf16.msrb.mxu3 %v1133_v41 }
 0x594   : > { %962 = vmatpush.bf16.msrb.mxu3 %v1132_v42 }
 0x598   : > { %963 = vmatpush.bf16.msrb.mxu3 %v1131_v45 }
 0x59c   : > { %964 = vmatpush.bf16.msrb.mxu3 %v1130_v47 }
 0x5c0   : > { %v665_v49 = vpop.f32.mrf.mxu1 }
 0x5c1   : > { %v669_v50 = vpack.c.bf16 %v665_v49, %v665_v49 }
 0x5c3   : > { %671 = vrot.lane.b32.xlu0 %v669_v50, %s1302_s26  ;;  %s1051_s26 = sshll.u32 %s402_s20, 3 }
 0x5c4   : > { %s404_s19 = scalar_lea.vmem [#allocation3], %s1051_s26  ;;  %s1246_s26 = scalar_lea.hbm %s1592_s12, 16 }
 0x5c5   : > { %s985_s0 = sshll.u32 %s404_s19, 4  ;;  %s986_s0 = int_to_ptr.vmem [resolvable:$true] %s985_s0 }
 0x5c8   : > { %v667_v51 = vpop.f32.mrf.mxu1 }
 0x5d4   : > { %v601_v52 = vpop.f32.mrf.mxu2 }
 0x5d5   : > { %v605_v53 = vpack.c.bf16 %v601_v52, %v601_v52 }
 0x5d7   : > { %607 = vrot.lane.b32.xlu2 %v605_v53, %s1303_s28  ;;  %s1121_s28 = sshll.u32 %s1392_s25, 3  ;;  %s973_s25 = scalar_lea.sflag [#allocation4], %s402_s20 }
 0x5d8   : > { %s983_s18 = scalar_lea.hbm %s1592_s12, %s1121_s28 }
 0x5d9   : > { %s987_s1 = sshll.u32 %s983_s18, 4  ;;  %s988_s1 = int_to_ptr.hbm [resolvable:$true] %s987_s1 }
 0x5da   : > { %s1240_s2 = sshra.s32 %s988_s1, 4  ;;  %s1241_s2 = int_to_ptr.hbm [resolvable:$true] %s1240_s2 }
 0x5db   : > { %p1247_p0 = scmp.lt.s32.totalorder %s1241_s2, %s1592_s12 }
 0x5dc   : > { %v603_v54 = vpop.f32.mrf.mxu2 }
 0x606   : > { %v729_v55 = vpop.f32.mrf.mxu2 }
 0x607   : > { %v733_v56 = vpack.c.bf16 %v729_v55, %v729_v55 }
 0x609   : > { %735 = vrot.lane.b32.xlu2 %v733_v56, %s1304_s29  ;;  %s1242_s29 = scalar_lea.hbm %s1241_s2, 8 }
 0x60a   : > { %p1243_p11 = scmp.ne.s32.totalorder %s1241_s2, %s1242_s29  ;;  %p1248_p1 = scmp.lt.s32.totalorder %s1246_s26, %s1242_s29 }
 0x60c   : > { %p1244_p12 = pnand %p1243_p11, %p1409_p5  ;;  %p1249_p2 = por %p1248_p1, %p1247_p0 }
 0x60e   : > { %v731_v57 = vpop.f32.mrf.mxu2  ;;  %p1245_p13 = pneg %p1244_p12 }
 0x610   : > { %p1250_p3 = pnand %p1249_p2, %p1245_p13 }
 0x631   : > { %v608_v59 = vpop.permute.xlu2 %607 }
 0x632   : > { %611 = vst.msk [vmem:[#allocation2] sm:$0xf] %vm610_vm8, %v608_v59 }
 0x635   : > { %v672_v60 = vpop.permute.xlu0 %671 }
 0x636   : > { %675 = vst.msk [vmem:[#allocation2] sm:$0xf] %vm674_vm9, %v672_v60 }
 0x663   : > { %v736_v62 = vpop.permute.xlu2 %735 }
 0x664   : > { %739 = vst.msk [vmem:[#allocation2] sm:$0xf] %vm738_vm10, %v736_v62 }
 0x66b   : > { %v740_v63 = vld [vmem:[#allocation2] sm:$0xf] }
 0x66c   : > { %1078 = vmatmul.msk.bf16.vlgmr.msra.gmra.mxu0 %vm413_vm0, %v740_v63 }
 0x6e9   : > { %v769_v2 = vpop.f32.mrf.mxu0 }
 0x6ea   : > { %v773_v3 = vadd.f32 %v769_v2, %v1424_v0  ;;  %v1129_v0 = vld [vmem:[%s1588_s8 + $0x8] sm:$0xff] }
 0x6eb   : > { %841 = vmatpush.bf16.msra.mxu1 %v1129_v0 }
 0x6ec   : > { %v1495_v4 = vadd.f32 %v1195_v1, %v773_v3 }
 0x6ee   : > { %v781_v5 = vsel %vm413_vm0, %v1495_v4, 0.0 }
 0x6ef   : > { %782 = vadd.xlane.f32.xlu0 %v781_v5  ;;  %842 = vmatpush.bf16.msra.mxu1 %v1128_v13 }
 0x6f1   : > { %v771_v6 = vpop.f32.mrf.mxu0 }
 0x762   : > { %v783_v7 = vpop.xlane.xlu0 %782 }
 0x763   : > { %v784_v9 = vmul.f32 %v783_v7, %v1428_v8 }
 0x765   : > { %v785_v10 = vsub.f32 %v1495_v4, %v784_v9  ;;  %v1305_v9 = vmov -1.0  }
 0x767   : > { %v786_v11 = vmul.f32 %v785_v10, %v785_v10 }
 0x769   : > { %v787_v12 = vsel %vm413_vm0, %v786_v11, 0.0 }
 0x76a   : > { %788 = vadd.xlane.f32.xlu1 %v787_v12 }
 0x7dd   : > { %v789_v14 = vpop.xlane.xlu1 %788 }
 0x7de   : > { %v790_v15 = vmul.f32 %v789_v14, %v1428_v8  ;;  %v1197_v8 = vld [vmem:[%s1587_s7] ss:$0 sm:$0xff] }
 0x7e0   : > { %v791_v16 = vadd.f32 1e-05, %v790_v15  ;;  %v1199_v15 = vld [vmem:[%s1591_s11] ss:$0 sm:$0xff] }
 0x7e2   : > { %1220 = vrsqrt.f32 %v791_v16  ;;  %vm798_vm12 = vweird.f32 %v791_v16 }
 0x7e8   : > { %v1221_v17 = vpop.eup %1220 }
 0x7e9   : > { %v793_v18 = vmul.f32 %v1221_v17, %v791_v16  ;;  %vm799_vm11 = vweird.f32 %v1221_v17 }
 0x7ea   : > { %vm800_vm13 = vmor %vm798_vm12, %vm799_vm11 }
 0x7eb   : > { %v794_v19 = vmul.f32 %v1221_v17, %v793_v18 }
 0x7ed   : > { %v795_v20 = vmul.f32 0.5, %v794_v19 }
 0x7ef   : > { %v796_v21 = vsub.f32 1.5, %v795_v20 }
 0x7f1   : > { %v797_v22 = vmul.f32 %v1221_v17, %v796_v21 }
 0x7f3   : > { %v801_v24 = vsel %vm800_vm13, %v1221_v17, %v797_v22 }
 0x7f4   : > { %v802_v25 = vmul.f32 %v801_v24, %v785_v10 }
 0x7f6   : > { %v806_v26 = vmul.f32 %v1196_v23, %v802_v25 }
 0x7f8   : > { %v810_v27 = vadd.f32 %v1197_v8, %v806_v26 }
 0x7fa   : > { %v811_v28 = vpack.c.bf16 %v810_v27, %v810_v27 }
 0x7fc   : > { %1087 = vmatmul.msk.bf16.vlgmr.msra.gmra.mxu1 %vm413_vm0, %v811_v28 }
 0x879   : > { %v844_v32 = vpop.f32.mrf.mxu1 }
 0x87a   : > { %v845_v33 = vadd.f32 %v1198_v30, %v844_v32 }
 0x87c   : > { %v849_v36 = vmul.f32 0.70710677, %v845_v33  ;;  %v848_v12 = vmul.f32 0.5, %v845_v33 }
 0x87e   : > { %v852_v37 = vand.u32 2147483647, %v849_v36  ;;  %vm850_vm3 = vcmp.ge.f32.partialorder %v849_v36, 0.0 }
 0x87f   : > { %v851_v10 = vsel %vm850_vm3, 1.0, %v1305_v9 }
 0x880   : > { %v853_v35 = vmul.f32 0.3275911, %v852_v37  ;;  %v879_v55 = vsub.f32 0.0, %v852_v37 }
 0x881   : > { %v846_v39 = vpop.f32.mrf.mxu1 }
 0x882   : > { %v854_v40 = vadd.f32 1.0, %v853_v35  ;;  %v880_v58 = vmul.f32 %v879_v55, %v852_v37 }
 0x884   : > { %1222 = vrcp.f32 %v854_v40  ;;  %v866_v48 = vand.u32 2147483648, %v854_v40  ;;  %v864_v50 = vand.u32 2147483647, %v854_v40  ;;  %vm860_vm15 = vweird.f32 %v854_v40 }
 0x885   : > { %v881_v61 = vmul.f32 1.442695, %v880_v58 }
 0x886   : > { %v867_v52 = vor.u32 1.1754944e-38, %v866_v48  ;;  %vm865_vm2 = vcmp.eq.f32.partialorder %v864_v50, 8.507059e+37 }
 0x887   : > { %1224 = vpow2.f32 %v881_v61 }
 0x88a   : > { %v1223_v43 = vpop.eup %1222 }
 0x88b   : > { %v856_v44 = vmul.f32 %v1223_v43, %v854_v40  ;;  %vm861_vm14 = vweird.f32 %v1223_v43 }
 0x88c   : > { %vm862_vm1 = vmor %vm860_vm15, %vm861_vm14 }
 0x88d   : > { %v857_v46 = vsub.f32 1.0, %v856_v44  ;;  %v1225_v5 = vpop.eup %1224 }
 0x88f   : > { %v858_v49 = vmul.f32 %v1223_v43, %v857_v46 }
 0x891   : > { %v859_v51 = vadd.f32 %v1223_v43, %v858_v49 }
 0x893   : > { %v863_v53 = vsel %vm862_vm1, %v1223_v43, %v859_v51 }
 0x894   : > { %v868_v54 = vsel %vm865_vm2, %v867_v52, %v863_v53 }
 0x895   : > { %v870_v56 = vmul.f32 1.0614054, %v868_v54 }
 0x897   : > { %v871_v57 = vadd.f32 -1.4531521, %v870_v56 }
 0x899   : > { %v872_v59 = vmul.f32 %v871_v57, %v868_v54 }
 0x89b   : > { %v873_v60 = vadd.f32 1.4214138, %v872_v59 }
 0x89d   : > { %v874_v62 = vmul.f32 %v873_v60, %v868_v54 }
 0x89f   : > { %v875_v63 = vadd.f32 -0.28449672, %v874_v62 }
 0x8a1   : > { %v876_v1 = vmul.f32 %v875_v63, %v868_v54 }
 0x8a3   : > { %v877_v2 = vadd.f32 0.2548296, %v876_v1 }
 0x8a5   : > { %v878_v3 = vmul.f32 %v877_v2, %v868_v54 }
 0x8a7   : > { %v883_v6 = vmul.f32 %v1225_v5, %v878_v3 }
 0x8a9   : > { %v884_v7 = vsub.f32 1.0, %v883_v6 }
 0x8ab   : > { %v885_v11 = vmul.f32 %v884_v7, %v851_v10 }
 0x8ad   : > { %v886_v0 = vadd.f32 1.0, %v885_v11 }
 0x8af   : > { %v887_v13 = vmul.f32 %v886_v0, %v848_v12 }
 0x8b1   : > { %v888_v14 = vpack.c.bf16 %v887_v13, %v887_v13 }
 0x8b3   : > { %965 = vmatmul.bf16.vlgmr.msrb.gmra.mxu3 %v888_v14 }
 0x936   : > { %v966_v16 = vpop.f32.mrf.mxu3 }
 0x937   : > { %v967_v17 = vadd.f32 %v1199_v15, %v966_v16 }
 0x939   : > { %v970_v18 = vadd.f32 %v967_v17, %v1495_v4 }
 0x93b   : > { %971 = vst.msk [vmem:[%s404_s19] sm:$0xff] %vm413_vm0, %v970_v18 }
 0x93c   : > { %1253 = shalt.err (!%p1250_p3)
}
 0x93d   : > { %1138 = dma.vmem_to_hbm [thread:$0]  (%p1409_p5), %s986_s0, 128, %s988_s1, %s973_s25  }
 0x93e   : > { %v968_v4 = vpop.f32.mrf.mxu3 }
 0x93f PF: > { %p1144_p4 = scmp.ge.s32.totalorder %s1288_s24, 2  ;;  %s999_s20 = sand.u32 1, %s1276_s21  }
 0x940   : > { %s1000_s18 = scalar_lea.sflag [#allocation4], %s999_s20 }
 0x941   : > { %p1141_p7 = pnand %p1144_p4, %p1413_p6 }
 0x943   : > { %p1142_p8 = pneg %p1141_p7 }
 0x945   : > { %1271 = dma.done.wait (%p1142_p8), %s1000_s18, 128  }
 0x946   : > { %1273 = vsyncadd (%p1142_p8), %s1000_s18, 4294967168  ;;  %p22_p9 = scmp.ge.s32.totalorder %s1396_s27, 4   ;;  %s1601_s21 = smov %s1280_s22 }
 0x947   : > { %s1602_s22 = smov %s1284_s23  ;;  %s1603_s23 = smov %s1407_s30 }
 0x948   : > { %s1604_s24 = smov %s1396_s27  ;;  %24 = sbr.rel (!%p22_p9) target bundleno = 7 (0x7), region = 103 }
 0x94d   :  { %1006 = vsyncpa [#allocation4], 1 }
 0x94e   :  { %1008 = vsyncpa [#allocation4 + $0x1], 1 }

</bundles_post_ra>
